<compile_context>
chip_gen: v7x
topology: tpu7x:2x2x1
jax: 0.10.0
libtpu: 0.0.40
codegen_flags: <defaults>
</compile_context>

<pallas_src>
import functools

import jax
import jax.numpy as jnp
from jax import lax
from jax.experimental import pallas as pl
from jax.experimental.pallas import tpu as pltpu


def _round_up(x, n):
    return ((x + n - 1) // n) * n


def _pick_tile_m(m_total):
    # Keep the MXU M dimension >= 256 (full width on v6e/v7x) and give the
    # M grid axis >= 2 steps (v7x megacore) once the problem is big enough;
    # a single big tile otherwise (single-TC chips want no forced split).
    if m_total >= 1024:
        return 512
    if m_total >= 512:
        return 256
    return max(8, _round_up(m_total, 8))


def _pick_tile_k(k_pad):
    for tk in (1024, 512, 256, 128):
        if k_pad % tk == 0:
            return tk
    return k_pad


def _vmem_budget(tm, tk, cout_l):
    # Double-buffered inputs/outputs + f32 scratch accumulator + slack.
    need = (2 * tm * tk * 2          # x tile, bf16, 2 buffers
            + 2 * tk * cout_l * 2    # w tile, bf16, 2 buffers
            + 2 * cout_l * 4         # bias,   f32,  2 buffers
            + 2 * tm * cout_l * 4    # out tile, f32, 2 buffers
            + tm * cout_l * 4        # accumulator scratch
            + (2 << 20))             # headroom for compiler scratch
    # Floor at 16 MiB; cap v7x-safe (64 MiB per TensorCore physical).
    return int(min(max(need, 16 << 20), 48 << 20))


def _gemm_bias_kernel(x_ref, w_ref, b_ref, o_ref, acc_ref):
    # x_ref  : (tm, tk)      bf16  im2col rows of the activation
    # w_ref  : (tk, Cl)      bf16  flattened multi-rate filter slab slice
    # b_ref  : (1,  Cl)      f32   summed per-branch bias
    # o_ref  : (tm, Cl)      f32   output tile
    # acc_ref: (tm, Cl)      f32   scratch accumulator (lives across K steps)
    k = pl.program_id(1)

    @pl.when(k == 0)
    def _():
        acc_ref[...] = jnp.zeros_like(acc_ref)

    acc_ref[...] += jnp.dot(x_ref[...], w_ref[...],
                            preferred_element_type=jnp.float32)

    @pl.when(k == pl.num_programs(1) - 1)
    def _():
        o_ref[...] = (acc_ref[...] + b_ref[...]).astype(o_ref.dtype)


def aspp_forward(x_nchw, weights, biases, rates):
    """ASPP forward.

    x_nchw : (N, Cin, H, W)        PyTorch activation layout.
    weights: (R, 3, 3, Cin, Cout)  HWIO per rate (port PyTorch OIHW with
                                   w.transpose(2, 3, 1, 0) per branch).
    biases : (R, Cout)
    """
    N, Cin, H, W = x_nchw.shape
    R = len(rates)
    Cout = weights.shape[-1]
    rates = tuple(int(r) for r in rates)
    m = max(rates)                                     # uniform halo padding

    # ---- wrapper-side im2col (small-Cin regime) --------------------------
    # NHWC, bf16, single "same" pad of max(rates) on each side; then one
    # shifted slice per (rate, ky, kx) tap, concatenated along the K axis in
    # (rate, ky, kx, cin) order so it matches the flattened weight slab.
    x = jnp.transpose(x_nchw, (0, 2, 3, 1)).astype(jnp.bfloat16)
    xp = jnp.pad(x, ((0, 0), (m, m), (m, m), (0, 0)))
    cols = []
    for r in rates:
        for ky in range(3):
            for kx in range(3):
                dy = (ky - 1) * r + m
                dx = (kx - 1) * r + m
                cols.append(xp[:, dy:dy + H, dx:dx + W, :])
    patches = jnp.concatenate(cols, axis=-1)           # (N, H, W, K) bf16

    K = 9 * R * Cin
    M_total = N * H * W

    # Alignment + tile sizes.
    K_pad = _round_up(K, 128)                          # lane-dense contraction
    cout_l = _round_up(Cout, 128) if Cout >= 64 else Cout
    tm = _pick_tile_m(M_total)
    tk = _pick_tile_k(K_pad)
    M_pad = _round_up(M_total, tm)

    x_cols = patches.reshape(M_total, K)
    x_cols = jnp.pad(x_cols, ((0, M_pad - M_total), (0, K_pad - K)))

    # (R,3,3,Cin,Cout) -> (K, Cout) in the same (rate, ky, kx, cin) row order.
    w = weights.astype(jnp.float32).reshape(K, Cout)
    w = jnp.pad(w, ((0, K_pad - K), (0, cout_l - Cout))).astype(jnp.bfloat16)

    bias = jnp.pad(jnp.sum(biases.astype(jnp.float32), axis=0, keepdims=True),
                   ((0, 0), (0, cout_l - Cout)))       # (1, Cl) f32

    grid = (M_pad // tm, K_pad // tk)
    cost = pl.CostEstimate(
        flops=2 * M_pad * K_pad * cout_l,
        transcendentals=0,
        bytes_accessed=(x_cols.size * 2 + w.size * 2 + bias.size * 4
                        + M_pad * cout_l * 4),
    )

    out = pl.pallas_call(
        _gemm_bias_kernel,
        out_shape=jax.ShapeDtypeStruct((M_pad, cout_l), jnp.float32),
        grid_spec=pltpu.PrefetchScalarGridSpec(
            num_scalar_prefetch=0,
            grid=grid,
            in_specs=[
                pl.BlockSpec((tm, tk), lambda i, k: (i, k)),
                pl.BlockSpec((tk, cout_l), lambda i, k: (k, 0)),
                pl.BlockSpec((1, cout_l), lambda i, k: (0, 0)),
            ],
            out_specs=pl.BlockSpec((tm, cout_l), lambda i, k: (i, 0)),
            scratch_shapes=[pltpu.VMEM((tm, cout_l), jnp.float32)],
        ),
        compiler_params=pltpu.CompilerParams(
            dimension_semantics=("parallel", "arbitrary"),
            vmem_limit_bytes=_vmem_budget(tm, tk, cout_l)),
        cost_estimate=cost,
    )(x_cols, w, bias)

    out = out[:M_total, :Cout].reshape(N, H, W, Cout)  # drop M/lane padding
    return jnp.transpose(out, (0, 3, 1, 2)).astype(x_nchw.dtype)   # NCHW


def aspp_reference(x_nchw, weights, biases, rates):
    """Pure-JAX f32 reference (PyTorch module semantics)."""
    x = jnp.transpose(x_nchw, (0, 2, 3, 1)).astype(jnp.float32)
    out = None
    for ri, r in enumerate(rates):
        y = lax.conv_general_dilated(
            x, weights[ri].astype(jnp.float32),
            window_strides=(1, 1),
            padding=[(r, r), (r, r)],
            rhs_dilation=(r, r),
            dimension_numbers=("NHWC", "HWIO", "NHWC"),
        ) + biases[ri][None, None, None, :]
        out = y if out is None else out + y
    return jnp.transpose(out, (0, 3, 1, 2))


if __name__ == "__main__":
    # _ASPP(in_ch=4, out_ch=8, rates=(1, 2, 3)) at a small spatial size.
    N, Cin, Cout, H, W = 2, 4, 8, 16, 16
    rates = (1, 2, 3)

    key = jax.random.PRNGKey(0)
    kx, kw, kb = jax.random.split(key, 3)
    x = jax.random.normal(kx, (N, Cin, H, W), dtype=jnp.float32)

    # Module init: weight ~ N(0, 0.01).  Module bias init is 0; use a small
    # non-zero bias here purely to exercise the bias path of the forward.
    weights = 0.01 * jax.random.normal(
        kw, (len(rates), 3, 3, Cin, Cout), dtype=jnp.float32)
    biases = 0.1 * jax.random.normal(kb, (len(rates), Cout), dtype=jnp.float32)

    out = jax.block_until_ready(aspp_forward(x, weights, biases, rates))
    ref = aspp_reference(x, weights, biases, rates)

    assert out.shape == (N, Cout, H, W)
    # Kernel runs bf16 on the MXU with f32 accumulation; compare against the
    # f32 reference with a bf16-appropriate tolerance.
    assert jnp.allclose(out, ref, rtol=5e-2, atol=2e-2), "mismatch vs reference"

    print("KERNEL_OK")
</pallas_src>

<mosaic_0001>
module attributes {stable_mosaic.version = 11 : i64} {
  func.func @_gemm_bias_kernel(%arg0: i32, %arg1: i32, %arg2: memref<256x128xbf16, #tpu.memory_space<vmem>>, %arg3: memref<128x8xbf16, #tpu.memory_space<vmem>>, %arg4: memref<1x8xf32, #tpu.memory_space<vmem>>, %arg5: memref<256x8xf32, #tpu.memory_space<vmem>>, %arg6: memref<256x8xf32, #tpu.memory_space<vmem>>) attributes {dimension_semantics = [#tpu.dimension_semantics<parallel>, #tpu.dimension_semantics<arbitrary>], iteration_bounds = array<i64: 2, 1>, scalar_prefetch = 0 : i64, scratch_operands = 1 : i64, tpu.core_type = #tpu.core_type<tc>, window_params = [{transform_indices = @transform_0, window_bounds = array<i64: 256, 128>}, {transform_indices = @transform_1, window_bounds = array<i64: 128, 8>}, {pipeline_mode = #tpu.pipeline_mode<synchronous>, transform_indices = @transform_2, window_bounds = array<i64: 1, 8>}, {transform_indices = @transform_3, window_bounds = array<i64: 256, 8>}]} {
    %c0_i32 = arith.constant 0 : i32
    %0 = arith.cmpi eq, %arg1, %c0_i32 : i32
    %1 = arith.extui %0 : i1 to i32
    %c0_i32_0 = arith.constant 0 : i32
    %2 = arith.cmpi ne, %1, %c0_i32_0 : i32
    scf.if %2 {
      %cst_10 = arith.constant 0.000000e+00 : f32
      %12 = vector.broadcast %cst_10 : f32 to vector<256x8xf32>
      %c0_11 = arith.constant 0 : index
      %c0_12 = arith.constant 0 : index
      %13 = vector.load %arg6[%c0_11, %c0_12] : memref<256x8xf32, #tpu.memory_space<vmem>>, vector<256x8xf32>
      tpu.vector_store %arg6[%c0_11, %c0_12], %12 {strides = array<i32>} : memref<256x8xf32, #tpu.memory_space<vmem>>, vector<256x8xf32>,
    } else {
    }
    %c0 = arith.constant 0 : index
    %c0_1 = arith.constant 0 : index
    %3 = vector.load %arg6[%c0, %c0_1] : memref<256x8xf32, #tpu.memory_space<vmem>>, vector<256x8xf32>
    %c0_2 = arith.constant 0 : index
    %c0_3 = arith.constant 0 : index
    %4 = vector.load %arg2[%c0_2, %c0_3] : memref<256x128xbf16, #tpu.memory_space<vmem>>, vector<256x128xbf16>
    %c0_4 = arith.constant 0 : index
    %c0_5 = arith.constant 0 : index
    %5 = vector.load %arg3[%c0_4, %c0_5] : memref<128x8xbf16, #tpu.memory_space<vmem>>, vector<128x8xbf16>
    %cst = arith.constant dense<0.000000e+00> : vector<256x8xf32>
    %6 = tpu.matmul %4, %5, %cst {dimension_numbers = #tpu.dot_dimension_numbers<[1], [0], [0], [1], [0, 0, 1, 1], [], []>} : vector<256x128xbf16>, vector<128x8xbf16>, vector<256x8xf32> -> vector<256x8xf32>
    %7 = arith.addf %3, %6 : vector<256x8xf32>
    %c0_6 = arith.constant 0 : index
    %c0_7 = arith.constant 0 : index
    %8 = vector.load %arg6[%c0_6, %c0_7] : memref<256x8xf32, #tpu.memory_space<vmem>>, vector<256x8xf32>
    tpu.vector_store %arg6[%c0_6, %c0_7], %7 {strides = array<i32>} : memref<256x8xf32, #tpu.memory_space<vmem>>, vector<256x8xf32>,
    %c0_i32_8 = arith.constant 0 : i32
    %9 = arith.cmpi eq, %arg1, %c0_i32_8 : i32
    %10 = arith.extui %9 : i1 to i32
    %c0_i32_9 = arith.constant 0 : i32
    %11 = arith.cmpi ne, %10, %c0_i32_9 : i32
    scf.if %11 {
      %c0_10 = arith.constant 0 : index
      %c0_11 = arith.constant 0 : index
      %12 = vector.load %arg6[%c0_10, %c0_11] : memref<256x8xf32, #tpu.memory_space<vmem>>, vector<256x8xf32>
      %c0_12 = arith.constant 0 : index
      %c0_13 = arith.constant 0 : index
      %13 = vector.load %arg4[%c0_12, %c0_13] : memref<1x8xf32, #tpu.memory_space<vmem>>, vector<1x8xf32>
      %14 = vector.broadcast %13 : vector<1x8xf32> to vector<256x8xf32>
      %15 = arith.addf %12, %14 : vector<256x8xf32>
      %c0_14 = arith.constant 0 : index
      %c0_15 = arith.constant 0 : index
      %16 = vector.load %arg5[%c0_14, %c0_15] : memref<256x8xf32, #tpu.memory_space<vmem>>, vector<256x8xf32>
      tpu.vector_store %arg5[%c0_14, %c0_15], %15 {strides = array<i32>} : memref<256x8xf32, #tpu.memory_space<vmem>>, vector<256x8xf32>,
    } else {
    }
    return
  }
  func.func @transform_0(%arg0: i32, %arg1: i32) -> (i32, i32) {
    %c0_i32 = arith.constant 0 : i32
    return %arg0, %arg1 : i32, i32
  }
  func.func @transform_1(%arg0: i32, %arg1: i32) -> (i32, i32) {
    %c0_i32 = arith.constant 0 : i32
    %c0_i32_0 = arith.constant 0 : i32
    return %arg1, %c0_i32 : i32, i32
  }
  func.func @transform_2(%arg0: i32, %arg1: i32) -> (i32, i32) {
    %c0_i32 = arith.constant 0 : i32
    %c0_i32_0 = arith.constant 0 : i32
    %c0_i32_1 = arith.constant 0 : i32
    return %c0_i32, %c0_i32_0 : i32, i32
  }
  func.func @transform_3(%arg0: i32, %arg1: i32) -> (i32, i32) {
    %c0_i32 = arith.constant 0 : i32
    %c0_i32_0 = arith.constant 0 : i32
    return %arg0, %c0_i32 : i32, i32
  }
}

</mosaic_0001>

<bundles_post_ra>
// kernel: tpu_custom_call.1
= control target key start
LH: loop header
LB: loop body
LE: loop exit
PB: predicated region body
PF: predicated region fallthrough
CT: control target
= control target key end

     0   :  { %8 = vsyncpa [#allocation4], 0  ;;  %s1574_s0 = inlined_call_operand.hbm [shape: bf16[512,128], index: 0, kind: input, shape index: {}]   ;;  %s1575_s1 = inlined_call_operand.vmem [shape: bf16[128,8], index: 1, kind: input, shape index: {}]   ;;  %s1576_s2 = inlined_call_operand.vmem [shape: f32[1,8], index: 2, kind: input, shape index: {}]   ;;  %s1577_s3 = inlined_call_operand.vmem [shape: f32[512,8], index: 3, kind: output, shape index: {}]  }
   0x1   :  { %10 = vsyncpa [#allocation4 + $0x1], 0  ;;  %s1233_s12 = smov 0   ;;  %s1235_s13 = smov 0  }
   0x2   :  { %s1237_s14 = smov 0   ;;  %s1239_s15 = smov 0  }
   0x3   :  { %s1241_s16 = smov 0   ;;  %s1243_s17 = smov 0  }
   0x4 LB: > { %s917_s18 = sadd.s32 4294967295, %s1207_s17   ;;  %s28_s19 = sadd.s32 1, %s1203_s16  ;;  %s1207_s17 = sphi %s1243_s17, %s16_s17   ;;  %s1203_s16 = sphi %s1241_s16, %s1586_s16   ;;  %s1199_s15 = sphi %s1239_s15, %s1585_s15   ;;  %s1195_s14 = sphi %s1237_s14, %s1584_s14   ;;  %s1191_s13 = sphi %s1235_s13, %s1583_s13   ;;  %s1187_s12 = sphi %s1233_s12, %s1582_s12  }
   0x5   : > { %p30_p0 = scmp.ge.s32.totalorder %s28_s19, 2  ;;  %s37_s20 = sadd.s32 1, %s1195_s14 }
   0x6   : > { %p44_p1 = scmp.ne.s32.totalorder %s1195_s14, %s1191_s13  ;;  %p45_p2 = scmp.eq.s32.totalorder %s1207_s17, 0 }
   0x7   : > { %s1588_s19 = smov (%p30_p0, %s28_s19), 0  ;;  %p50_p4 = scmp.ne.s32.totalorder %s1191_s13, %s1187_s12 }
   0x8   : > { %p1269_p3 = por %p45_p2, %p44_p1  ;;  %s32_s22 = ssub.s32 %s1203_s16, %s1588_s19 }
   0x9   : > { %p51_p5 = scmp.eq.s32.totalorder %s917_s18, 0  ;;  %p35_p6 = scmp.eq.s32.totalorder %s32_s22, 0 }
   0xa   : > { %p1051_p8 = scmp.lt.s32.totalorder %s1207_s17, 2  ;;  %s159_s25 = sand.u32 1, %s1195_s14  }
   0xb   : > { %p1276_p7 = por %p51_p5, %p50_p4  ;;  %s956_s26 = sshll.u32 %s1203_s16, 11 }
   0xc   : > { %s1282_s24 = scalar_select %p35_p6, %s1195_s14, %s37_s20  }
   0xd   : > { %s922_s27 = sshll.u32 %s159_s25, 7  ;;  %s1289_s30 = scalar_lea.hbm %s1574_s0, %s956_s26 }
   0xe   : > { %s163_s4 = scalar_lea.vmem [#allocation3], %s922_s27  ;;  %p1293_p9 = pnand %p1051_p8, %p1269_p3 }
   0xf   : > { %s171_s5 = sshll.u32 %s163_s4, 4  ;;  %s1299_s7 = scalar_lea.sflag [#allocation4], %s159_s25  ;;  %s1297_s5 = int_to_ptr.vmem [resolvable:$true] %s171_s5 }
  0x10   : > { %s1127_s8 = scalar_lea.hbm %s1289_s30, 2048  ;;  %p1129_p11 = pneg %p1293_p9 }
  0x11   : > { %p1128_p10 = scmp.ne.s32.totalorder %s1289_s30, %s1127_s8  ;;  %s1132_s11 = scalar_lea.hbm %s1574_s0, 4096 }
  0x12   : > { %p1133_p0 = scmp.lt.u32.totalorder %s1289_s30, %s1574_s0  ;;  %p1134_p1 = scmp.lt.u32.totalorder %s1132_s11, %s1127_s8 }
  0x13   : > { %p1130_p12 = pnand %p1129_p11, %p1128_p10  ;;  %p1136_p3 = scmp.lt.u32.totalorder %s1127_s8, %s1289_s30 }
  0x14   : > { %p1135_p2 = por %p1134_p1, %p1133_p0 }
  0x15   : > { %p1131_p13 = pneg %p1130_p12 }
  0x16   : > { %p1137_p4 = por %p1136_p3, %p1135_p2 }
  0x18   : > { %p1138_p5 = pnand %p1137_p4, %p1131_p13 }
  0x1a   : > { %1141 = shalt.err (!%p1138_p5)
}
  0x1b   : > { %s1142_s20 = scalar_lea.vmem %s1297_s5, 2048  ;;  %s1209_s21 = smov [#allocation3]  }
  0x1c   : > { %p1143_p6 = scmp.ne.s32.totalorder %s1297_s5, %s1142_s20  ;;  %s1147_s22 = sshll.u32 %s1209_s21, 4  ;;  %s1148_s22 = int_to_ptr.vmem [resolvable:$false] %s1147_s22 }
  0x1d   : > { %s1149_s25 = scalar_lea.vmem %s1148_s22, 4096  ;;  %p1150_p12 = scmp.lt.s32.totalorder %s1297_s5, %s1148_s22 }
  0x1e   : > { %p1145_p8 = pnand %p1143_p6, %p1129_p11  ;;  %p1151_p0 = scmp.lt.s32.totalorder %s1149_s25, %s1142_s20 }
  0x20   : > { %p1146_p10 = pneg %p1145_p8  ;;  %p1152_p1 = por %p1151_p0, %p1150_p12 }
  0x22   : > { %p1153_p2 = pnand %p1152_p1, %p1146_p10 }
  0x24   : > { %1156 = shalt.err (!%p1153_p2)
}
  0x25   : > { %s1210_s26 = smov 64   ;;  %s1211_s27 = smov 4  }
  0x26   : > { %1050 = dma.hbm_to_vmem [thread:$0]  (!%p1293_p9), %s1289_s30, 2048, %s1297_s5, %s1299_s7, %s1210_s26, %s1210_s26, %s1211_s27  }
  0x27   : > { %p925_p11 = scmp.ge.s32.totalorder %s1207_s17, 1  ;;  %p179_p13 = scmp.lt.s32.totalorder %s1207_s17, 3 }
  0x29   : > { %p180_p3 = pnand %p925_p11, %p179_p13 }
  0x2a   : > { %s185_s28 = sand.u32 (!%p180_p3), 1, %s1191_s13  }
  0x2b   : > { %183 = sbr.rel (%p180_p3) target bundleno = 339 (0x153), region = 32  ;;  %s926_s29 = sshll.u32 (!%p180_p3), %s185_s28, 7 }
  0x2c   : > { %s186_s4 = scalar_lea.sflag (!%p180_p3), [#allocation4], %s185_s28  ;;  %s1330_s8 = scalar_lea.vmem (!%p180_p3), [#allocation3], %s926_s29 }
  0x32   : > { %1182 = dma.done.wait (%p1276_p7), %s186_s4, 2048  }
  0x33   : > { %1184 = vsyncadd (%p1276_p7), %s186_s4, 4294965248  ;;  %vm235_vm0 = vcmask 64512   ;;  %v1212_v0 = vmov 0.0   ;;  %v1103_v1 = vld [vmem:[%s1575_s1] sm:$0xff]   ;;  %v1104_v2 = vld [vmem:[%s1575_s1 + $0x8] sm:$0xff]   ;;  %s927_s28 = sshll.u32 %s1199_s15, 5 }
  0x34   : > { %238 = vst.msk [vmem:[#allocation2 + $0x10] sm:$0xff] %vm235_vm0, %v1212_v0  ;;  %236 = vst.msk [vmem:[#allocation2] sm:$0xff] %vm235_vm0, %v1212_v0  ;;  %981 = vmatprep.subr.bf16.mxu0 %v1103_v1  ;;  %1029 = vmatprep.subr.bf16.mxu1 %v1103_v1  ;;  %v1105_v3 = vld [vmem:[%s1575_s1 + $0x10] sm:$0xff]   ;;  %v1106_v4 = vld [vmem:[%s1575_s1 + $0x18] sm:$0xff]   ;;  %p1409_p7 = scmp.lt.s32.totalorder %s927_s28, 63 }
  0x35   : > { %237 = vst.msk [vmem:[#allocation2 + $0x8] sm:$0xff] %vm235_vm0, %v1212_v0  ;;  %239 = vst.msk [vmem:[#allocation2 + $0x18] sm:$0xff] %vm235_vm0, %v1212_v0  ;;  %982 = vmatpush3.bf16.msra.mxu0 %v1103_v1  ;;  %1037 = vmatpush3.bf16.msra.mxu1 %v1103_v1  ;;  %v1111_v5 = vld [vmem:[%s1330_s8] sm:$0xff]   ;;  %v1108_v8 = vld [vmem:[%s1575_s1 + $0x28] sm:$0xff]  }
  0x36   : > { %240 = vst.msk [vmem:[#allocation2 + $0x20] sm:$0xff] %vm235_vm0, %v1212_v0  ;;  %241 = vst.msk [vmem:[#allocation2 + $0x28] sm:$0xff] %vm235_vm0, %v1212_v0  ;;  %983 = vmatprep.subr.bf16.mxu0 %v1104_v2  ;;  %1030 = vmatprep.subr.bf16.mxu1 %v1104_v2  ;;  %v1112_v6 = vld [vmem:[%s1330_s8 + $0x40] sm:$0xff]   ;;  %v1109_v9 = vld [vmem:[%s1575_s1 + $0x30] sm:$0xff]   ;;  %s1590_s28 = smov (!%p1409_p7, %s927_s28), 63 }
  0x37   : > { %242 = vst.msk [vmem:[#allocation2 + $0x30] sm:$0xff] %vm235_vm0, %v1212_v0  ;;  %243 = vst.msk [vmem:[#allocation2 + $0x38] sm:$0xff] %vm235_vm0, %v1212_v0  ;;  %997 = vmatprep.mubr.bf16.mxu0 %v1111_v5  ;;  %v1107_v7 = vld [vmem:[%s1575_s1 + $0x20] sm:$0xff]   ;;  %1013 = vmatprep.mubr.bf16.mxu1 %v1112_v6  ;;  %v1110_v10 = vld [vmem:[%s1575_s1 + $0x38] sm:$0xff]   ;;  %s928_s15 = sshll.u32 %s1590_s28, 3 }
  0x38   : > { %244 = vst.msk [vmem:[#allocation2 + $0x40] sm:$0xff] %vm235_vm0, %v1212_v0  ;;  %245 = vst.msk [vmem:[#allocation2 + $0x48] sm:$0xff] %vm235_vm0, %v1212_v0  ;;  %v1113_v11 = vld [vmem:[%s1330_s8 + $0x8] sm:$0xff]   ;;  %v1115_v13 = vld [vmem:[%s1330_s8 + $0x10] sm:$0xff]   ;;  %s1434_s5 = scalar_lea.vmem %s1577_s3, %s928_s15 }
  0x39   : > { %246 = vst.msk [vmem:[#allocation2 + $0x50] sm:$0xff] %vm235_vm0, %v1212_v0  ;;  %247 = vst.msk [vmem:[#allocation2 + $0x58] sm:$0xff] %vm235_vm0, %v1212_v0  ;;  %984 = vmatpush3.bf16.msra.mxu0 %v1104_v2  ;;  %1038 = vmatpush3.bf16.msra.mxu1 %v1104_v2  ;;  %v1114_v12 = vld [vmem:[%s1330_s8 + $0x48] sm:$0xff]   ;;  %v1116_v14 = vld [vmem:[%s1330_s8 + $0x50] sm:$0xff]  }
  0x3a   : > { %248 = vst.msk [vmem:[#allocation2 + $0x60] sm:$0xff] %vm235_vm0, %v1212_v0  ;;  %249 = vst.msk [vmem:[#allocation2 + $0x68] sm:$0xff] %vm235_vm0, %v1212_v0  ;;  %985 = vmatprep.subr.bf16.mxu0 %v1105_v3  ;;  %1031 = vmatprep.subr.bf16.mxu1 %v1105_v3  ;;  %v1117_v15 = vld [vmem:[%s1330_s8 + $0x18] sm:$0xff]   ;;  %v1119_v17 = vld [vmem:[%s1330_s8 + $0x20] sm:$0xff]  }
  0x3b   : > { %250 = vst.msk [vmem:[#allocation2 + $0x70] sm:$0xff] %vm235_vm0, %v1212_v0  ;;  %251 = vst.msk [vmem:[#allocation2 + $0x78] sm:$0xff] %vm235_vm0, %v1212_v0  ;;  %v1118_v16 = vld [vmem:[%s1330_s8 + $0x58] sm:$0xff]   ;;  %v1120_v18 = vld [vmem:[%s1330_s8 + $0x60] sm:$0xff]  }
  0x3c   : > { %252 = vst.msk [vmem:[#allocation2 + $0x80] sm:$0xff] %vm235_vm0, %v1212_v0  ;;  %253 = vst.msk [vmem:[#allocation2 + $0x88] sm:$0xff] %vm235_vm0, %v1212_v0  ;;  %v1121_v19 = vld [vmem:[%s1330_s8 + $0x28] sm:$0xff]   ;;  %v1123_v21 = vld [vmem:[%s1330_s8 + $0x30] sm:$0xff]  }
  0x3d   : > { %254 = vst.msk [vmem:[#allocation2 + $0x90] sm:$0xff] %vm235_vm0, %v1212_v0  ;;  %255 = vst.msk [vmem:[#allocation2 + $0x98] sm:$0xff] %vm235_vm0, %v1212_v0  ;;  %986 = vmatpush3.bf16.msra.mxu0 %v1105_v3  ;;  %1039 = vmatpush3.bf16.msra.mxu1 %v1105_v3  ;;  %v1122_v20 = vld [vmem:[%s1330_s8 + $0x68] sm:$0xff]   ;;  %v1124_v22 = vld [vmem:[%s1330_s8 + $0x70] sm:$0xff]  }
  0x3e   : > { %256 = vst.msk [vmem:[#allocation2 + $0xa0] sm:$0xff] %vm235_vm0, %v1212_v0  ;;  %257 = vst.msk [vmem:[#allocation2 + $0xa8] sm:$0xff] %vm235_vm0, %v1212_v0  ;;  %987 = vmatprep.subr.bf16.mxu0 %v1106_v4  ;;  %1032 = vmatprep.subr.bf16.mxu1 %v1106_v4  ;;  %v1125_v23 = vld [vmem:[%s1330_s8 + $0x38] sm:$0xff]   ;;  %v270_v25 = vld [vmem:[#allocation2 + $0x10] sm:$0xff] }
  0x3f   : > { %258 = vst.msk [vmem:[#allocation2 + $0xb0] sm:$0xff] %vm235_vm0, %v1212_v0  ;;  %259 = vst.msk [vmem:[#allocation2 + $0xb8] sm:$0xff] %vm235_vm0, %v1212_v0  ;;  %v1126_v24 = vld [vmem:[%s1330_s8 + $0x78] sm:$0xff]   ;;  %v268_v27 = vld [vmem:[#allocation2] sm:$0xff] }
  0x40   : > { %260 = vst.msk [vmem:[#allocation2 + $0xc0] sm:$0xff] %vm235_vm0, %v1212_v0  ;;  %261 = vst.msk [vmem:[#allocation2 + $0xc8] sm:$0xff] %vm235_vm0, %v1212_v0  ;;  %v271_v31 = vld [vmem:[#allocation2 + $0x18] sm:$0xff]  ;;  %v269_v37 = vld [vmem:[#allocation2 + $0x8] sm:$0xff] }
  0x41   : > { %262 = vst.msk [vmem:[#allocation2 + $0xd0] sm:$0xff] %vm235_vm0, %v1212_v0  ;;  %263 = vst.msk [vmem:[#allocation2 + $0xd8] sm:$0xff] %vm235_vm0, %v1212_v0  ;;  %988 = vmatpush3.bf16.msra.mxu0 %v1106_v4  ;;  %1040 = vmatpush3.bf16.msra.mxu1 %v1106_v4  ;;  %v274_v49 = vld [vmem:[#allocation2 + $0x30] sm:$0xff]  ;;  %v272_v51 = vld [vmem:[#allocation2 + $0x20] sm:$0xff] }
  0x42   : > { %264 = vst.msk [vmem:[#allocation2 + $0xe0] sm:$0xff] %vm235_vm0, %v1212_v0  ;;  %265 = vst.msk [vmem:[#allocation2 + $0xe8] sm:$0xff] %vm235_vm0, %v1212_v0  ;;  %989 = vmatprep.subr.bf16.mxu0 %v1107_v7  ;;  %1033 = vmatprep.subr.bf16.mxu1 %v1107_v7  ;;  %v1429_v53 = vld [vmem:[%s1576_s2] ss:$0 sm:$0xff]  ;;  %v275_v56 = vld [vmem:[#allocation2 + $0x38] sm:$0xff] }
  0x43   : > { %266 = vst.msk [vmem:[#allocation2 + $0xf0] sm:$0xff] %vm235_vm0, %v1212_v0  ;;  %267 = vst.msk [vmem:[#allocation2 + $0xf8] sm:$0xff] %vm235_vm0, %v1212_v0  ;;  %v284_v28 = vld [vmem:[#allocation2 + $0x80] sm:$0xff]  ;;  %v285_v38 = vld [vmem:[#allocation2 + $0x88] sm:$0xff] }
  0x44   : > { %v286_v26 = vld [vmem:[#allocation2 + $0x90] sm:$0xff]  ;;  %v287_v32 = vld [vmem:[#allocation2 + $0x98] sm:$0xff]  ;;  %v273_v62 = vld [vmem:[#allocation2 + $0x28] sm:$0xff] }
  0x45   : > { %990 = vmatpush3.bf16.msra.mxu0 %v1107_v7  ;;  %1041 = vmatpush3.bf16.msra.mxu1 %v1107_v7  ;;  %v288_v52 = vld [vmem:[#allocation2 + $0xa0] sm:$0xff]  ;;  %v289_v63 = vld [vmem:[#allocation2 + $0xa8] sm:$0xff] }
  0x46   : > { %991 = vmatprep.subr.bf16.mxu0 %v1108_v8  ;;  %1034 = vmatprep.subr.bf16.mxu1 %v1108_v8  ;;  %v290_v50 = vld [vmem:[#allocation2 + $0xb0] sm:$0xff]  ;;  %v291_v57 = vld [vmem:[#allocation2 + $0xb8] sm:$0xff] }
  0x49   : > { %992 = vmatpush3.bf16.msra.mxu0 %v1108_v8  ;;  %1042 = vmatpush3.bf16.msra.mxu1 %v1108_v8 }
  0x4a   : > { %993 = vmatprep.subr.bf16.mxu0 %v1109_v9  ;;  %1035 = vmatprep.subr.bf16.mxu1 %v1109_v9 }
  0x4d   : > { %994 = vmatpush3.bf16.msra.mxu0 %v1109_v9  ;;  %1043 = vmatpush3.bf16.msra.mxu1 %v1109_v9 }
  0x4e   : > { %995 = vmatprep.subr.bf16.mxu0 %v1110_v10  ;;  %1036 = vmatprep.subr.bf16.mxu1 %v1110_v10 }
  0x51   : > { %996 = vmatpush3.bf16.msra.mxu0 %v1110_v10  ;;  %1044 = vmatpush3.bf16.msra.mxu1 %v1110_v10 }
  0x54   : > { %998 = vmatmul.mubr.bf16.vlgmr.msra.gmra.mrb[0].mxu0 %v1113_v11  ;;  %1014 = vmatmul.mubr.bf16.vlgmr.msra.gmra.mrb[0].mxu1 %v1114_v12 }
  0x55   : > { %1001 = vmatprep.mubr.bf16.mxu0 %v1115_v13  ;;  %1017 = vmatprep.mubr.bf16.mxu1 %v1116_v14 }
  0x5c   : > { %1002 = vmatmul.mubr.bf16.gmra.mrb[4].mxu0 %v1117_v15  ;;  %1018 = vmatmul.mubr.bf16.gmra.mrb[4].mxu1 %v1118_v16 }
  0x5d   : > { %1005 = vmatprep.mubr.bf16.mxu0 %v1119_v17  ;;  %1021 = vmatprep.mubr.bf16.mxu1 %v1120_v18 }
  0x64   : > { %1006 = vmatmul.mubr.bf16.gmra.mrb[8].mxu0 %v1121_v19  ;;  %1022 = vmatmul.mubr.bf16.gmra.mrb[8].mxu1 %v1122_v20 }
  0x65   : > { %1009 = vmatprep.mubr.bf16.mxu0 %v1123_v21  ;;  %1025 = vmatprep.mubr.bf16.mxu1 %v1124_v22 }
  0x6c   : > { %1010 = vmatmul.mubr.bf16.gmra.mrb[12].mxu0 %v1125_v23  ;;  %1026 = vmatmul.mubr.bf16.gmra.mrb[12].mxu1 %v1126_v24 }
 0x127   : > { %v999_v29 = vpop.f32.mrb[0].mxu0  ;;  %v1015_v30 = vpop.f32.mrb[0].mxu1 }
 0x128   : > { %v655_v33 = vadd.f32 %v999_v29, %v270_v25  ;;  %v671_v34 = vadd.f32 %v1015_v30, %v286_v26  ;;  %v526_v35 = vpop.f32.mrb[1].mxu0  ;;  %v590_v36 = vpop.f32.mrb[1].mxu1  ;;  %v278_v26 = vld [vmem:[#allocation2 + $0x50] sm:$0xff]  ;;  %v292_v29 = vld [vmem:[#allocation2 + $0xc0] sm:$0xff] }
 0x129   : > { %v653_v39 = vadd.f32 %v526_v35, %v268_v27  ;;  %v669_v40 = vadd.f32 %v590_v36, %v284_v28  ;;  %v1000_v41 = vpop.f32.mrb[2].mxu0  ;;  %v1016_v42 = vpop.f32.mrb[2].mxu1  ;;  %v294_v27 = vld [vmem:[#allocation2 + $0xd0] sm:$0xff]  ;;  %v276_v28 = vld [vmem:[#allocation2 + $0x40] sm:$0xff] }
 0x12a   : > { %688 = vst.msk [vmem:[#allocation2 + $0x10] sm:$0xff] %vm235_vm0, %v655_v33  ;;  %704 = vst.msk [vmem:[#allocation2 + $0x90] sm:$0xff] %vm235_vm0, %v671_v34  ;;  %v656_v43 = vadd.f32 %v1000_v41, %v271_v31  ;;  %v672_v44 = vadd.f32 %v1016_v42, %v287_v32  ;;  %v529_v45 = vpop.f32.mrb[3].mxu0  ;;  %v593_v46 = vpop.f32.mrb[3].mxu1  ;;  %v279_v32 = vld [vmem:[#allocation2 + $0x58] sm:$0xff] }
 0x12b   : > { %686 = vst.msk [vmem:[#allocation2] sm:$0xff] %vm235_vm0, %v653_v39  ;;  %702 = vst.msk [vmem:[#allocation2 + $0x80] sm:$0xff] %vm235_vm0, %v669_v40  ;;  %v654_v47 = vadd.f32 %v529_v45, %v269_v37  ;;  %v670_v48 = vadd.f32 %v593_v46, %v285_v38  ;;  %v295_v33 = vld [vmem:[#allocation2 + $0xd8] sm:$0xff]  ;;  %v277_v38 = vld [vmem:[#allocation2 + $0x48] sm:$0xff] }
 0x12c   : > { %689 = vst.msk [vmem:[#allocation2 + $0x18] sm:$0xff] %vm235_vm0, %v656_v43  ;;  %705 = vst.msk [vmem:[#allocation2 + $0x98] sm:$0xff] %vm235_vm0, %v672_v44  ;;  %v293_v39 = vld [vmem:[#allocation2 + $0xc8] sm:$0xff] }
 0x12d   : > { %687 = vst.msk [vmem:[#allocation2 + $0x8] sm:$0xff] %vm235_vm0, %v654_v47  ;;  %703 = vst.msk [vmem:[#allocation2 + $0x88] sm:$0xff] %vm235_vm0, %v670_v48 }
 0x12f   : > { %v1003_v54 = vpop.f32.mrb[4].mxu0  ;;  %v1019_v55 = vpop.f32.mrb[4].mxu1 }
 0x130   : > { %v659_v58 = vadd.f32 %v1003_v54, %v274_v49  ;;  %v675_v59 = vadd.f32 %v1019_v55, %v290_v50  ;;  %v542_v60 = vpop.f32.mrb[5].mxu0  ;;  %v606_v61 = vpop.f32.mrb[5].mxu1 }
 0x131   : > { %v723_v0 = vld [vmem:[#allocation2 + $0x10] sm:$0xff]  ;;  %v657_v2 = vadd.f32 %v542_v60, %v272_v51  ;;  %v673_v3 = vadd.f32 %v606_v61, %v288_v52  ;;  %v1004_v4 = vpop.f32.mrb[6].mxu0  ;;  %v1020_v5 = vpop.f32.mrb[6].mxu1 }
 0x132   : > { %v739_v1 = vld [vmem:[#allocation2 + $0x90] sm:$0xff]  ;;  %v762_v6 = vadd.f32 %v1429_v53, %v723_v0  ;;  %v721_v8 = vld [vmem:[#allocation2] sm:$0xff]  ;;  %692 = vst.msk [vmem:[#allocation2 + $0x30] sm:$0xff] %vm235_vm0, %v659_v58  ;;  %708 = vst.msk [vmem:[#allocation2 + $0xb0] sm:$0xff] %vm235_vm0, %v675_v59  ;;  %v660_v10 = vadd.f32 %v1004_v4, %v275_v56  ;;  %v676_v11 = vadd.f32 %v1020_v5, %v291_v57  ;;  %v545_v12 = vpop.f32.mrb[7].mxu0  ;;  %v609_v13 = vpop.f32.mrb[7].mxu1 }
 0x133   : > { %v778_v7 = vadd.f32 %v1429_v53, %v739_v1  ;;  %v737_v9 = vld [vmem:[#allocation2 + $0x80] sm:$0xff]  ;;  %v760_v14 = vadd.f32 %v1429_v53, %v721_v8  ;;  %v724_v16 = vld [vmem:[#allocation2 + $0x18] sm:$0xff]  ;;  %690 = vst.msk [vmem:[#allocation2 + $0x20] sm:$0xff] %vm235_vm0, %v657_v2  ;;  %706 = vst.msk [vmem:[#allocation2 + $0xa0] sm:$0xff] %vm235_vm0, %v673_v3  ;;  %v658_v18 = vadd.f32 %v545_v12, %v273_v62 }
 0x134   : > { %v776_v15 = vadd.f32 %v1429_v53, %v737_v9  ;;  %v740_v17 = vld [vmem:[#allocation2 + $0x98] sm:$0xff]  ;;  %v674_v19 = vadd.f32 %v609_v13, %v289_v63  ;;  %794 = vst.msk [vmem:[%s1434_s5 + $0x10] sm:$0xff] %vm235_vm0, %v762_v6  ;;  %v763_v20 = vadd.f32 %v1429_v53, %v724_v16  ;;  %v722_v22 = vld [vmem:[#allocation2 + $0x8] sm:$0xff]  ;;  %693 = vst.msk [vmem:[#allocation2 + $0x38] sm:$0xff] %vm235_vm0, %v660_v10 }
 0x135   : > { %810 = vst.msk [vmem:[%s1434_s5 + $0x90] sm:$0xff] %vm235_vm0, %v778_v7  ;;  %v779_v21 = vadd.f32 %v1429_v53, %v740_v17  ;;  %v738_v23 = vld [vmem:[#allocation2 + $0x88] sm:$0xff]  ;;  %709 = vst.msk [vmem:[#allocation2 + $0xb8] sm:$0xff] %vm235_vm0, %v676_v11  ;;  %v761_v24 = vadd.f32 %v1429_v53, %v722_v22  ;;  %v282_v3 = vld [vmem:[#allocation2 + $0x70] sm:$0xff] }
 0x136   : > { %792 = vst.msk [vmem:[%s1434_s5] sm:$0xff] %vm235_vm0, %v760_v14  ;;  %808 = vst.msk [vmem:[%s1434_s5 + $0x80] sm:$0xff] %vm235_vm0, %v776_v15  ;;  %v777_v25 = vadd.f32 %v1429_v53, %v738_v23  ;;  %v298_v4 = vld [vmem:[#allocation2 + $0xf0] sm:$0xff]  ;;  %v280_v5 = vld [vmem:[#allocation2 + $0x60] sm:$0xff] }
 0x137   : > { %691 = vst.msk [vmem:[#allocation2 + $0x28] sm:$0xff] %vm235_vm0, %v658_v18  ;;  %707 = vst.msk [vmem:[#allocation2 + $0xa8] sm:$0xff] %vm235_vm0, %v674_v19  ;;  %v1007_v30 = vpop.f32.mrb[8].mxu0  ;;  %v1023_v31 = vpop.f32.mrb[8].mxu1  ;;  %v296_v6 = vld [vmem:[#allocation2 + $0xe0] sm:$0xff]  ;;  %v283_v9 = vld [vmem:[#allocation2 + $0x78] sm:$0xff] }
 0x138   : > { %795 = vst.msk [vmem:[%s1434_s5 + $0x18] sm:$0xff] %vm235_vm0, %v763_v20  ;;  %811 = vst.msk [vmem:[%s1434_s5 + $0x98] sm:$0xff] %vm235_vm0, %v779_v21  ;;  %v663_v34 = vadd.f32 %v1007_v30, %v278_v26  ;;  %v679_v35 = vadd.f32 %v1023_v31, %v294_v27  ;;  %v558_v36 = vpop.f32.mrb[9].mxu0  ;;  %v622_v37 = vpop.f32.mrb[9].mxu1  ;;  %v299_v10 = vld [vmem:[#allocation2 + $0xf8] sm:$0xff]  ;;  %v281_v15 = vld [vmem:[#allocation2 + $0x68] sm:$0xff] }
 0x139   : > { %793 = vst.msk [vmem:[%s1434_s5 + $0x8] sm:$0xff] %vm235_vm0, %v761_v24  ;;  %809 = vst.msk [vmem:[%s1434_s5 + $0x88] sm:$0xff] %vm235_vm0, %v777_v25  ;;  %v727_v40 = vld [vmem:[#allocation2 + $0x30] sm:$0xff]  ;;  %v661_v42 = vadd.f32 %v558_v36, %v276_v28  ;;  %v677_v43 = vadd.f32 %v622_v37, %v292_v29  ;;  %v1008_v44 = vpop.f32.mrb[10].mxu0  ;;  %v1024_v45 = vpop.f32.mrb[10].mxu1  ;;  %v297_v16 = vld [vmem:[#allocation2 + $0xe8] sm:$0xff] }
 0x13a   : > { %v743_v41 = vld [vmem:[#allocation2 + $0xb0] sm:$0xff]  ;;  %v766_v46 = vadd.f32 %v1429_v53, %v727_v40  ;;  %v725_v48 = vld [vmem:[#allocation2 + $0x20] sm:$0xff]  ;;  %696 = vst.msk [vmem:[#allocation2 + $0x50] sm:$0xff] %vm235_vm0, %v663_v34  ;;  %712 = vst.msk [vmem:[#allocation2 + $0xd0] sm:$0xff] %vm235_vm0, %v679_v35  ;;  %v664_v50 = vadd.f32 %v1008_v44, %v279_v32  ;;  %v680_v51 = vadd.f32 %v1024_v45, %v295_v33  ;;  %v561_v52 = vpop.f32.mrb[11].mxu0  ;;  %v625_v54 = vpop.f32.mrb[11].mxu1 }
 0x13b   : > { %v782_v47 = vadd.f32 %v1429_v53, %v743_v41  ;;  %v741_v49 = vld [vmem:[#allocation2 + $0xa0] sm:$0xff]  ;;  %v764_v55 = vadd.f32 %v1429_v53, %v725_v48  ;;  %v728_v57 = vld [vmem:[#allocation2 + $0x38] sm:$0xff]  ;;  %694 = vst.msk [vmem:[#allocation2 + $0x40] sm:$0xff] %vm235_vm0, %v661_v42  ;;  %710 = vst.msk [vmem:[#allocation2 + $0xc0] sm:$0xff] %vm235_vm0, %v677_v43  ;;  %v662_v59 = vadd.f32 %v561_v52, %v277_v38 }
 0x13c   : > { %v780_v56 = vadd.f32 %v1429_v53, %v741_v49  ;;  %v744_v58 = vld [vmem:[#allocation2 + $0xb8] sm:$0xff]  ;;  %v678_v60 = vadd.f32 %v625_v54, %v293_v39  ;;  %798 = vst.msk [vmem:[%s1434_s5 + $0x30] sm:$0xff] %vm235_vm0, %v766_v46  ;;  %v767_v61 = vadd.f32 %v1429_v53, %v728_v57  ;;  %697 = vst.msk [vmem:[#allocation2 + $0x58] sm:$0xff] %vm235_vm0, %v664_v50 }
 0x13d   : > { %814 = vst.msk [vmem:[%s1434_s5 + $0xb0] sm:$0xff] %vm235_vm0, %v782_v47  ;;  %v783_v62 = vadd.f32 %v1429_v53, %v744_v58  ;;  %713 = vst.msk [vmem:[#allocation2 + $0xd8] sm:$0xff] %vm235_vm0, %v680_v51 }
 0x13e   : > { %v726_v63 = vld [vmem:[#allocation2 + $0x28] sm:$0xff]  ;;  %796 = vst.msk [vmem:[%s1434_s5 + $0x20] sm:$0xff] %vm235_vm0, %v764_v55  ;;  %812 = vst.msk [vmem:[%s1434_s5 + $0xa0] sm:$0xff] %vm235_vm0, %v780_v56 }
 0x13f   : > { %v742_v0 = vld [vmem:[#allocation2 + $0xa8] sm:$0xff]  ;;  %v765_v1 = vadd.f32 %v1429_v53, %v726_v63  ;;  %695 = vst.msk [vmem:[#allocation2 + $0x48] sm:$0xff] %vm235_vm0, %v662_v59  ;;  %711 = vst.msk [vmem:[#allocation2 + $0xc8] sm:$0xff] %vm235_vm0, %v678_v60  ;;  %v1011_v7 = vpop.f32.mrb[12].mxu0  ;;  %v1027_v8 = vpop.f32.mrb[12].mxu1 }
 0x140   : > { %v781_v2 = vadd.f32 %v1429_v53, %v742_v0  ;;  %799 = vst.msk [vmem:[%s1434_s5 + $0x38] sm:$0xff] %vm235_vm0, %v767_v61  ;;  %815 = vst.msk [vmem:[%s1434_s5 + $0xb8] sm:$0xff] %vm235_vm0, %v783_v62  ;;  %v667_v11 = vadd.f32 %v1011_v7, %v282_v3  ;;  %v683_v12 = vadd.f32 %v1027_v8, %v298_v4  ;;  %v574_v13 = vpop.f32.mrb[13].mxu0  ;;  %v638_v14 = vpop.f32.mrb[13].mxu1 }
 0x141   : > { %797 = vst.msk [vmem:[%s1434_s5 + $0x28] sm:$0xff] %vm235_vm0, %v765_v1  ;;  %v731_v17 = vld [vmem:[#allocation2 + $0x50] sm:$0xff]  ;;  %v665_v19 = vadd.f32 %v574_v13, %v280_v5  ;;  %v681_v20 = vadd.f32 %v638_v14, %v296_v6  ;;  %v1012_v21 = vpop.f32.mrb[14].mxu0  ;;  %v1028_v22 = vpop.f32.mrb[14].mxu1 }
 0x142   : > { %813 = vst.msk [vmem:[%s1434_s5 + $0xa8] sm:$0xff] %vm235_vm0, %v781_v2  ;;  %v747_v18 = vld [vmem:[#allocation2 + $0xd0] sm:$0xff]  ;;  %v770_v23 = vadd.f32 %v1429_v53, %v731_v17  ;;  %v729_v25 = vld [vmem:[#allocation2 + $0x40] sm:$0xff]  ;;  %700 = vst.msk [vmem:[#allocation2 + $0x70] sm:$0xff] %vm235_vm0, %v667_v11  ;;  %v668_v27 = vadd.f32 %v1012_v21, %v283_v9  ;;  %v684_v28 = vadd.f32 %v1028_v22, %v299_v10  ;;  %v577_v29 = vpop.f32.mrb[15].mxu0  ;;  %v641_v30 = vpop.f32.mrb[15].mxu1 }
 0x143   : > { %v786_v24 = vadd.f32 %v1429_v53, %v747_v18  ;;  %v745_v26 = vld [vmem:[#allocation2 + $0xc0] sm:$0xff]  ;;  %716 = vst.msk [vmem:[#allocation2 + $0xf0] sm:$0xff] %vm235_vm0, %v683_v12  ;;  %v768_v31 = vadd.f32 %v1429_v53, %v729_v25  ;;  %v732_v33 = vld [vmem:[#allocation2 + $0x58] sm:$0xff]  ;;  %698 = vst.msk [vmem:[#allocation2 + $0x60] sm:$0xff] %vm235_vm0, %v665_v19  ;;  %v666_v35 = vadd.f32 %v577_v29, %v281_v15 }
 0x144   : > { %v784_v32 = vadd.f32 %v1429_v53, %v745_v26  ;;  %v748_v34 = vld [vmem:[#allocation2 + $0xd8] sm:$0xff]  ;;  %714 = vst.msk [vmem:[#allocation2 + $0xe0] sm:$0xff] %vm235_vm0, %v681_v20  ;;  %v682_v36 = vadd.f32 %v641_v30, %v297_v16  ;;  %802 = vst.msk [vmem:[%s1434_s5 + $0x50] sm:$0xff] %vm235_vm0, %v770_v23  ;;  %v771_v37 = vadd.f32 %v1429_v53, %v732_v33 }
 0x145   : > { %818 = vst.msk [vmem:[%s1434_s5 + $0xd0] sm:$0xff] %vm235_vm0, %v786_v24  ;;  %v787_v38 = vadd.f32 %v1429_v53, %v748_v34  ;;  %701 = vst.msk [vmem:[#allocation2 + $0x78] sm:$0xff] %vm235_vm0, %v668_v27 }
 0x146   : > { %v730_v39 = vld [vmem:[#allocation2 + $0x48] sm:$0xff]  ;;  %717 = vst.msk [vmem:[#allocation2 + $0xf8] sm:$0xff] %vm235_vm0, %v684_v28  ;;  %800 = vst.msk [vmem:[%s1434_s5 + $0x40] sm:$0xff] %vm235_vm0, %v768_v31 }
 0x147   : > { %v746_v40 = vld [vmem:[#allocation2 + $0xc8] sm:$0xff]  ;;  %816 = vst.msk [vmem:[%s1434_s5 + $0xc0] sm:$0xff] %vm235_vm0, %v784_v32  ;;  %v769_v41 = vadd.f32 %v1429_v53, %v730_v39  ;;  %699 = vst.msk [vmem:[#allocation2 + $0x68] sm:$0xff] %vm235_vm0, %v666_v35 }
 0x148   : > { %v785_v42 = vadd.f32 %v1429_v53, %v746_v40  ;;  %715 = vst.msk [vmem:[#allocation2 + $0xe8] sm:$0xff] %vm235_vm0, %v682_v36  ;;  %803 = vst.msk [vmem:[%s1434_s5 + $0x58] sm:$0xff] %vm235_vm0, %v771_v37 }
 0x149   : > { %819 = vst.msk [vmem:[%s1434_s5 + $0xd8] sm:$0xff] %vm235_vm0, %v787_v38  ;;  %801 = vst.msk [vmem:[%s1434_s5 + $0x48] sm:$0xff] %vm235_vm0, %v769_v41  ;;  %v735_v43 = vld [vmem:[#allocation2 + $0x70] sm:$0xff] }
 0x14a   : > { %817 = vst.msk [vmem:[%s1434_s5 + $0xc8] sm:$0xff] %vm235_vm0, %v785_v42  ;;  %v751_v44 = vld [vmem:[#allocation2 + $0xf0] sm:$0xff]  ;;  %v774_v45 = vadd.f32 %v1429_v53, %v735_v43  ;;  %v733_v47 = vld [vmem:[#allocation2 + $0x60] sm:$0xff] }
 0x14b   : > { %v790_v46 = vadd.f32 %v1429_v53, %v751_v44  ;;  %v749_v48 = vld [vmem:[#allocation2 + $0xe0] sm:$0xff]  ;;  %v772_v49 = vadd.f32 %v1429_v53, %v733_v47 }
 0x14c   : > { %v788_v50 = vadd.f32 %v1429_v53, %v749_v48  ;;  %v736_v51 = vld [vmem:[#allocation2 + $0x78] sm:$0xff]  ;;  %806 = vst.msk [vmem:[%s1434_s5 + $0x70] sm:$0xff] %vm235_vm0, %v774_v45 }
 0x14d   : > { %v752_v52 = vld [vmem:[#allocation2 + $0xf8] sm:$0xff]  ;;  %822 = vst.msk [vmem:[%s1434_s5 + $0xf0] sm:$0xff] %vm235_vm0, %v790_v46  ;;  %v775_v54 = vadd.f32 %v1429_v53, %v736_v51  ;;  %804 = vst.msk [vmem:[%s1434_s5 + $0x60] sm:$0xff] %vm235_vm0, %v772_v49 }
 0x14e   : > { %v791_v55 = vadd.f32 %v1429_v53, %v752_v52  ;;  %v734_v56 = vld [vmem:[#allocation2 + $0x68] sm:$0xff]  ;;  %820 = vst.msk [vmem:[%s1434_s5 + $0xe0] sm:$0xff] %vm235_vm0, %v788_v50 }
 0x14f   : > { %v750_v57 = vld [vmem:[#allocation2 + $0xe8] sm:$0xff]  ;;  %v773_v58 = vadd.f32 %v1429_v53, %v734_v56  ;;  %807 = vst.msk [vmem:[%s1434_s5 + $0x78] sm:$0xff] %vm235_vm0, %v775_v54 }
 0x150   : > { %v789_v59 = vadd.f32 %v1429_v53, %v750_v57  ;;  %823 = vst.msk [vmem:[%s1434_s5 + $0xf8] sm:$0xff] %vm235_vm0, %v791_v55 }
 0x151   : > { %805 = vst.msk [vmem:[%s1434_s5 + $0x68] sm:$0xff] %vm235_vm0, %v773_v58 }
 0x152   : > { %821 = vst.msk [vmem:[%s1434_s5 + $0xe8] sm:$0xff] %vm235_vm0, %v789_v59 }
 0x153 PF: > { %s16_s17 = sadd.s32 1, %s1207_s17   ;;  %s1582_s12 = smov %s1191_s13 }
 0x154   : > { %p13_p9 = scmp.ge.s32.totalorder %s16_s17, 4   ;;  %s1583_s13 = smov %s1195_s14 }
 0x155   : > { %s1584_s14 = smov %s1282_s24  ;;  %s1585_s15 = smov %s1203_s16 }
 0x156   : > { %s1586_s16 = smov %s1588_s19  ;;  %15 = sbr.rel (!%p13_p9) target bundleno = 4 (0x4), region = 83 }
 0x15d   :  { %846 = vsyncpa [#allocation4], 1 }
 0x15e   :  { %848 = vsyncpa [#allocation4 + $0x1], 1 }

</bundles_post_ra>
